<compile_context>
chip_gen: v6e
topology: v6e:2x2x1
jax: 0.10.0
libtpu: 0.0.40
codegen_flags: <defaults>
</compile_context>

<pallas_src>
import jax
import jax.numpy as jnp
from jax.experimental import pallas as pl
from jax.experimental.pallas import tpu as pltpu


def _round_up(n, m):
    return ((n + m - 1) // m) * m


def _pad2(a, shape):
    """Zero-pad a 2-D array up to `shape` (trailing padding only)."""
    return jnp.pad(a, [(0, shape[0] - a.shape[0]), (0, shape[1] - a.shape[1])])


def model_fixed_kernel(
    x_ref,                 # (TM, D_IN_P)
    w1_ref, b1_ref,        # (D_IN_P, D_H_P), (1, D_H_P)
    w2_ref, b2_ref,        # (D_H_P,  D_H_P), (1, D_H_P)
    w3_ref, b3_ref,        # (D_H_P,  D_H_P), (1, D_H_P)
    w4_ref, b4_ref,        # (D_H_P,  D_OUT_P), (1, D_OUT_P)
    out_ref,               # (TM, D_OUT_P)
):
    x = x_ref[...]

    # linear1 + relu
    h = jnp.dot(x, w1_ref[...], preferred_element_type=jnp.float32) + b1_ref[...]
    h = jnp.maximum(h, 0.0)

    # linear2 + relu
    h = jnp.dot(h, w2_ref[...], preferred_element_type=jnp.float32) + b2_ref[...]
    h = jnp.maximum(h, 0.0)

    # linear3 + tanh
    h = jnp.dot(h, w3_ref[...], preferred_element_type=jnp.float32) + b3_ref[...]
    h = jnp.tanh(h)

    # linear4 + fixed clamp to [0.0, 0.5]  (ModelFixed: lower=0, upper=0.5)
    y = jnp.dot(h, w4_ref[...], preferred_element_type=jnp.float32) + b4_ref[...]
    y = jnp.maximum(0.0, jnp.minimum(0.5, y))

    out_ref[...] = y.astype(out_ref.dtype)


def model_fixed_forward(x, params, *, tm=None, lane=128):
    """x: (N, d_in) f32.  params: (w1,b1,...,w4,b4) with W stored as (in, out)."""
    N, d_in = x.shape
    w1, b1, w2, b2, w3, b3, w4, b4 = params
    d_h = w1.shape[1]
    d_out = w4.shape[1]

    # --- lane-dense feature padding (zero pad to a multiple of 128) ---------
    d_in_p = _round_up(d_in, lane)
    d_h_p = _round_up(d_h, lane)
    d_out_p = _round_up(d_out, lane)

    # --- batch tile: whole batch for small N, 512-row tiles otherwise -------
    # VMEM per step (f32): x + out tiles = 2 * tm * 128 * 4  (<= 512 KiB at tm=512)
    # plus 4 resident weight tiles (~256 KiB) -> comfortably within limits.
    if tm is None:
        tm = min(_round_up(N, 8), 512)
    n_p = _round_up(N, tm)

    x_p = _pad2(x, (n_p, d_in_p))
    w1p = _pad2(w1, (d_in_p, d_h_p))
    w2p = _pad2(w2, (d_h_p, d_h_p))
    w3p = _pad2(w3, (d_h_p, d_h_p))
    w4p = _pad2(w4, (d_h_p, d_out_p))
    b1p = _pad2(b1.reshape(1, d_h), (1, d_h_p))
    b2p = _pad2(b2.reshape(1, d_h), (1, d_h_p))
    b3p = _pad2(b3.reshape(1, d_h), (1, d_h_p))
    b4p = _pad2(b4.reshape(1, d_out), (1, d_out_p))

    # Weights / biases: constant block index -> stay resident across grid steps.
    full = lambda r, c: pl.BlockSpec((r, c), lambda i: (0, 0))

    out_p = pl.pallas_call(
        model_fixed_kernel,
        out_shape=jax.ShapeDtypeStruct((n_p, d_out_p), x.dtype),
        grid_spec=pltpu.PrefetchScalarGridSpec(
            num_scalar_prefetch=0,
            grid=(n_p // tm,),
            in_specs=[
                pl.BlockSpec((tm, d_in_p), lambda i: (i, 0)),   # x tile
                full(d_in_p, d_h_p), full(1, d_h_p),            # W1, b1
                full(d_h_p, d_h_p), full(1, d_h_p),             # W2, b2
                full(d_h_p, d_h_p), full(1, d_h_p),             # W3, b3
                full(d_h_p, d_out_p), full(1, d_out_p),         # W4, b4
            ],
            out_specs=pl.BlockSpec((tm, d_out_p), lambda i: (i, 0)),
        ),
        compiler_params=pltpu.CompilerParams(
            dimension_semantics=("parallel",)
        ),
    )(x_p, w1p, b1p, w2p, b2p, w3p, b3p, w4p, b4p)

    # Strip the padding back off (layout plumbing only).
    return out_p[:N, :d_out]


def init_params(key, d_in, d_h, d_out):
    """Deterministic init mimicking nn.Linear's U(-1/sqrt(fan_in), 1/sqrt(fan_in)).
    Weights stored as (in, out) so the kernel computes x @ W + b."""
    ks = jax.random.split(key, 8)

    def linear(kw, kb, fan_in, fan_out):
        bound = 1.0 / jnp.sqrt(fan_in)
        w = jax.random.uniform(kw, (fan_in, fan_out), jnp.float32, -bound, bound)
        b = jax.random.uniform(kb, (fan_out,), jnp.float32, -bound, bound)
        return w, b

    w1, b1 = linear(ks[0], ks[1], d_in, d_h)
    w2, b2 = linear(ks[2], ks[3], d_h, d_h)
    w3, b3 = linear(ks[4], ks[5], d_h, d_h)
    w4, b4 = linear(ks[6], ks[7], d_h, d_out)
    return (w1, b1, w2, b2, w3, b3, w4, b4)


def reference_forward(x, params):
    """Pure-JAX reference of ModelFixed.forward for the correctness check."""
    w1, b1, w2, b2, w3, b3, w4, b4 = params
    h = jnp.maximum(x @ w1 + b1, 0.0)
    h = jnp.maximum(h @ w2 + b2, 0.0)
    h = jnp.tanh(h @ w3 + b3)
    y = h @ w4 + b4
    return jnp.maximum(0.0, jnp.minimum(0.5, y))


if __name__ == "__main__":
    # equation.dim_y + equation.dim_d = 8 (e.g. dim_y=4, dim_d=4), dim_h = 32
    D_IN = 8      # dim_y + dim_d
    D_H = 32      # hidden width
    D_OUT = D_IN  # linear4 maps back to dim_y + dim_d
    N = 64        # batch of sample paths

    key = jax.random.PRNGKey(0)
    k_x, k_p = jax.random.split(key)

    x = jax.random.normal(k_x, (N, D_IN), dtype=jnp.float32)
    params = init_params(k_p, D_IN, D_H, D_OUT)

    beta = model_fixed_forward(x, params)
    jax.block_until_ready(beta)

    ref = reference_forward(x, params)
    assert beta.shape == (N, D_OUT)
    assert jnp.allclose(beta, ref, atol=1e-5, rtol=1e-5)

    print("KERNEL_OK")
</pallas_src>

<mosaic_0001>
module attributes {stable_mosaic.version = 11 : i64} {
  func.func @model_fixed_kernel(%arg0: i32, %arg1: memref<64x128xf32, #tpu.memory_space<vmem>>, %arg2: memref<128x128xf32, #tpu.memory_space<vmem>>, %arg3: memref<1x128xf32, #tpu.memory_space<vmem>>, %arg4: memref<128x128xf32, #tpu.memory_space<vmem>>, %arg5: memref<1x128xf32, #tpu.memory_space<vmem>>, %arg6: memref<128x128xf32, #tpu.memory_space<vmem>>, %arg7: memref<1x128xf32, #tpu.memory_space<vmem>>, %arg8: memref<128x128xf32, #tpu.memory_space<vmem>>, %arg9: memref<1x128xf32, #tpu.memory_space<vmem>>, %arg10: memref<64x128xf32, #tpu.memory_space<vmem>>) attributes {dimension_semantics = [#tpu.dimension_semantics<parallel>], iteration_bounds = array<i64: 1>, scalar_prefetch = 0 : i64, scratch_operands = 0 : i64, tpu.core_type = #tpu.core_type<tc>, window_params = [{transform_indices = @transform_0, window_bounds = array<i64: 64, 128>}, {pipeline_mode = #tpu.pipeline_mode<synchronous>, transform_indices = @transform_1, window_bounds = array<i64: 128, 128>}, {pipeline_mode = #tpu.pipeline_mode<synchronous>, transform_indices = @transform_2, window_bounds = array<i64: 1, 128>}, {pipeline_mode = #tpu.pipeline_mode<synchronous>, transform_indices = @transform_3, window_bounds = array<i64: 128, 128>}, {pipeline_mode = #tpu.pipeline_mode<synchronous>, transform_indices = @transform_4, window_bounds = array<i64: 1, 128>}, {pipeline_mode = #tpu.pipeline_mode<synchronous>, transform_indices = @transform_5, window_bounds = array<i64: 128, 128>}, {pipeline_mode = #tpu.pipeline_mode<synchronous>, transform_indices = @transform_6, window_bounds = array<i64: 1, 128>}, {pipeline_mode = #tpu.pipeline_mode<synchronous>, transform_indices = @transform_7, window_bounds = array<i64: 128, 128>}, {pipeline_mode = #tpu.pipeline_mode<synchronous>, transform_indices = @transform_8, window_bounds = array<i64: 1, 128>}, {transform_indices = @transform_9, window_bounds = array<i64: 64, 128>}]} {
    %c0 = arith.constant 0 : index
    %c0_0 = arith.constant 0 : index
    %0 = vector.load %arg1[%c0, %c0_0] : memref<64x128xf32, #tpu.memory_space<vmem>>, vector<64x128xf32>
    %c0_1 = arith.constant 0 : index
    %c0_2 = arith.constant 0 : index
    %1 = vector.load %arg2[%c0_1, %c0_2] : memref<128x128xf32, #tpu.memory_space<vmem>>, vector<128x128xf32>
    %cst = arith.constant dense<0.000000e+00> : vector<64x128xf32>
    %2 = tpu.matmul %0, %1, %cst {dimension_numbers = #tpu.dot_dimension_numbers<[1], [0], [0], [1], [0, 0, 1, 1], [], []>} : vector<64x128xf32>, vector<128x128xf32>, vector<64x128xf32> -> vector<64x128xf32>
    %c0_3 = arith.constant 0 : index
    %c0_4 = arith.constant 0 : index
    %3 = vector.load %arg3[%c0_3, %c0_4] : memref<1x128xf32, #tpu.memory_space<vmem>>, vector<1x128xf32>
    %4 = vector.broadcast %3 : vector<1x128xf32> to vector<64x128xf32>
    %5 = arith.addf %2, %4 : vector<64x128xf32>
    %cst_5 = arith.constant 0.000000e+00 : f32
    %6 = vector.broadcast %cst_5 : f32 to vector<64x128xf32>
    %7 = arith.maximumf %5, %6 : vector<64x128xf32>
    %c0_6 = arith.constant 0 : index
    %c0_7 = arith.constant 0 : index
    %8 = vector.load %arg4[%c0_6, %c0_7] : memref<128x128xf32, #tpu.memory_space<vmem>>, vector<128x128xf32>
    %cst_8 = arith.constant dense<0.000000e+00> : vector<64x128xf32>
    %9 = tpu.matmul %7, %8, %cst_8 {dimension_numbers = #tpu.dot_dimension_numbers<[1], [0], [0], [1], [0, 0, 1, 1], [], []>} : vector<64x128xf32>, vector<128x128xf32>, vector<64x128xf32> -> vector<64x128xf32>
    %c0_9 = arith.constant 0 : index
    %c0_10 = arith.constant 0 : index
    %10 = vector.load %arg5[%c0_9, %c0_10] : memref<1x128xf32, #tpu.memory_space<vmem>>, vector<1x128xf32>
    %11 = vector.broadcast %10 : vector<1x128xf32> to vector<64x128xf32>
    %12 = arith.addf %9, %11 : vector<64x128xf32>
    %cst_11 = arith.constant 0.000000e+00 : f32
    %13 = vector.broadcast %cst_11 : f32 to vector<64x128xf32>
    %14 = arith.maximumf %12, %13 : vector<64x128xf32>
    %c0_12 = arith.constant 0 : index
    %c0_13 = arith.constant 0 : index
    %15 = vector.load %arg6[%c0_12, %c0_13] : memref<128x128xf32, #tpu.memory_space<vmem>>, vector<128x128xf32>
    %cst_14 = arith.constant dense<0.000000e+00> : vector<64x128xf32>
    %16 = tpu.matmul %14, %15, %cst_14 {dimension_numbers = #tpu.dot_dimension_numbers<[1], [0], [0], [1], [0, 0, 1, 1], [], []>} : vector<64x128xf32>, vector<128x128xf32>, vector<64x128xf32> -> vector<64x128xf32>
    %c0_15 = arith.constant 0 : index
    %c0_16 = arith.constant 0 : index
    %17 = vector.load %arg7[%c0_15, %c0_16] : memref<1x128xf32, #tpu.memory_space<vmem>>, vector<1x128xf32>
    %18 = vector.broadcast %17 : vector<1x128xf32> to vector<64x128xf32>
    %19 = arith.addf %16, %18 : vector<64x128xf32>
    %20 = math.tanh %19 : vector<64x128xf32>
    %c0_17 = arith.constant 0 : index
    %c0_18 = arith.constant 0 : index
    %21 = vector.load %arg8[%c0_17, %c0_18] : memref<128x128xf32, #tpu.memory_space<vmem>>, vector<128x128xf32>
    %cst_19 = arith.constant dense<0.000000e+00> : vector<64x128xf32>
    %22 = tpu.matmul %20, %21, %cst_19 {dimension_numbers = #tpu.dot_dimension_numbers<[1], [0], [0], [1], [0, 0, 1, 1], [], []>} : vector<64x128xf32>, vector<128x128xf32>, vector<64x128xf32> -> vector<64x128xf32>
    %c0_20 = arith.constant 0 : index
    %c0_21 = arith.constant 0 : index
    %23 = vector.load %arg9[%c0_20, %c0_21] : memref<1x128xf32, #tpu.memory_space<vmem>>, vector<1x128xf32>
    %24 = vector.broadcast %23 : vector<1x128xf32> to vector<64x128xf32>
    %25 = arith.addf %22, %24 : vector<64x128xf32>
    %cst_22 = arith.constant 5.000000e-01 : f32
    %26 = vector.broadcast %cst_22 : f32 to vector<64x128xf32>
    %27 = arith.minimumf %26, %25 : vector<64x128xf32>
    %cst_23 = arith.constant 0.000000e+00 : f32
    %28 = vector.broadcast %cst_23 : f32 to vector<64x128xf32>
    %29 = arith.maximumf %28, %27 : vector<64x128xf32>
    %c0_24 = arith.constant 0 : index
    %c0_25 = arith.constant 0 : index
    %30 = vector.load %arg10[%c0_24, %c0_25] : memref<64x128xf32, #tpu.memory_space<vmem>>, vector<64x128xf32>
    tpu.vector_store %arg10[%c0_24, %c0_25], %29 {strides = array<i32>} : memref<64x128xf32, #tpu.memory_space<vmem>>, vector<64x128xf32>,
    return
  }
  func.func @transform_0(%arg0: i32) -> (i32, i32) {
    %c0_i32 = arith.constant 0 : i32
    %c0_i32_0 = arith.constant 0 : i32
    return %arg0, %c0_i32 : i32, i32
  }
  func.func @transform_1(%arg0: i32) -> (i32, i32) {
    %c0_i32 = arith.constant 0 : i32
    %c0_i32_0 = arith.constant 0 : i32
    %c0_i32_1 = arith.constant 0 : i32
    return %c0_i32, %c0_i32_0 : i32, i32
  }
  func.func @transform_2(%arg0: i32) -> (i32, i32) {
    %c0_i32 = arith.constant 0 : i32
    %c0_i32_0 = arith.constant 0 : i32
    %c0_i32_1 = arith.constant 0 : i32
    return %c0_i32, %c0_i32_0 : i32, i32
  }
  func.func @transform_3(%arg0: i32) -> (i32, i32) {
    %c0_i32 = arith.constant 0 : i32
    %c0_i32_0 = arith.constant 0 : i32
    %c0_i32_1 = arith.constant 0 : i32
    return %c0_i32, %c0_i32_0 : i32, i32
  }
  func.func @transform_4(%arg0: i32) -> (i32, i32) {
    %c0_i32 = arith.constant 0 : i32
    %c0_i32_0 = arith.constant 0 : i32
    %c0_i32_1 = arith.constant 0 : i32
    return %c0_i32, %c0_i32_0 : i32, i32
  }
  func.func @transform_5(%arg0: i32) -> (i32, i32) {
    %c0_i32 = arith.constant 0 : i32
    %c0_i32_0 = arith.constant 0 : i32
    %c0_i32_1 = arith.constant 0 : i32
    return %c0_i32, %c0_i32_0 : i32, i32
  }
  func.func @transform_6(%arg0: i32) -> (i32, i32) {
    %c0_i32 = arith.constant 0 : i32
    %c0_i32_0 = arith.constant 0 : i32
    %c0_i32_1 = arith.constant 0 : i32
    return %c0_i32, %c0_i32_0 : i32, i32
  }
  func.func @transform_7(%arg0: i32) -> (i32, i32) {
    %c0_i32 = arith.constant 0 : i32
    %c0_i32_0 = arith.constant 0 : i32
    %c0_i32_1 = arith.constant 0 : i32
    return %c0_i32, %c0_i32_0 : i32, i32
  }
  func.func @transform_8(%arg0: i32) -> (i32, i32) {
    %c0_i32 = arith.constant 0 : i32
    %c0_i32_0 = arith.constant 0 : i32
    %c0_i32_1 = arith.constant 0 : i32
    return %c0_i32, %c0_i32_0 : i32, i32
  }
  func.func @transform_9(%arg0: i32) -> (i32, i32) {
    %c0_i32 = arith.constant 0 : i32
    %c0_i32_0 = arith.constant 0 : i32
    return %arg0, %c0_i32 : i32, i32
  }
}

</mosaic_0001>

<bundles_post_ra>
// kernel: tpu_custom_call.1
= control target key start
LH: loop header
LB: loop body
LE: loop exit
PB: predicated region body
PF: predicated region fallthrough
CT: control target
= control target key end

     0   :  { %14 = vsyncpa [#allocation3], 0  ;;  %s1222_s0 = inlined_call_operand.hbm [shape: f32[64,128], index: 0, kind: input, shape index: {}]   ;;  %s1223_s1 = inlined_call_operand.hbm [shape: f32[128,128], index: 1, kind: input, shape index: {}]   ;;  %s1224_s2 = inlined_call_operand.vmem [shape: f32[1,128], index: 2, kind: input, shape index: {}]   ;;  %s1225_s3 = inlined_call_operand.hbm [shape: f32[128,128], index: 3, kind: input, shape index: {}]   ;;  %s1226_s4 = inlined_call_operand.vmem [shape: f32[1,128], index: 4, kind: input, shape index: {}]   ;;  %s1227_s5 = inlined_call_operand.hbm [shape: f32[128,128], index: 5, kind: input, shape index: {}]   ;;  %s1228_s6 = inlined_call_operand.vmem [shape: f32[1,128], index: 6, kind: input, shape index: {}]   ;;  %s1229_s7 = inlined_call_operand.hbm [shape: f32[128,128], index: 7, kind: input, shape index: {}]   ;;  %s1230_s8 = inlined_call_operand.vmem [shape: f32[1,128], index: 8, kind: input, shape index: {}]   ;;  %s1231_s9 = inlined_call_operand.hbm [shape: f32[64,128], index: 9, kind: output, shape index: {}]  }
   0x1   :  { %15 = vsyncpa [#allocation6], 0 }
   0x2   :  { %16 = vsyncpa [#allocation9], 0 }
   0x3   :  { %17 = vsyncpa [#allocation4], 0  ;;  %s1116_s30 = smov [#allocation5]   ;;  %s1117_s11 = smov [#allocation8]  }
   0x4   :  { %s35_s10 = sshll.u32 %s1116_s30, 4  ;;  %s63_s12 = sshll.u32 %s1117_s11, 4  ;;  %s36_s10 = int_to_ptr.vmem [resolvable:$true] %s35_s10  ;;  %s64_s12 = int_to_ptr.vmem [resolvable:$true] %s63_s12 }
   0x5   :  { %s996_s13 = scalar_lea.vmem %s36_s10, 2048  ;;  %p1001_p1 = scmp.lt.s32.totalorder %s36_s10, %s36_s10 }
   0x6   :  { %p997_p0 = scmp.ne.s32.totalorder %s36_s10, %s996_s13  ;;  %p1002_p2 = scmp.lt.s32.totalorder %s996_s13, %s996_s13 }
   0x8   :  { %p1003_p3 = por %p1002_p2, %p1001_p1 }
   0xa   :  { %p1004_p4 = pnand %p1003_p3, %p997_p0 }
   0xc   :  { %1007 = shalt.err (!%p1004_p4)
}
   0xd   :  { %s1118_s14 = smov 128   ;;  %s1119_s15 = smov 8  }
   0xe   :  { %41 = dma.hbm_to_vmem [thread:$0]  %s1223_s1, 2048, %s36_s10, [#allocation6], %s1118_s14, %s1118_s14, %s1119_s15  }
   0xf   :  { %s1016_s18 = scalar_lea.vmem %s64_s12, 2048  ;;  %p1021_p6 = scmp.lt.s32.totalorder %s64_s12, %s64_s12 }
  0x10   :  { %p1017_p5 = scmp.ne.s32.totalorder %s64_s12, %s1016_s18  ;;  %p1022_p7 = scmp.lt.s32.totalorder %s1016_s18, %s1016_s18 }
  0x12   :  { %p1023_p8 = por %p1022_p7, %p1021_p6 }
  0x14   :  { %p1024_p9 = pnand %p1023_p8, %p1017_p5 }
  0x16   :  { %1027 = shalt.err (!%p1024_p9)
}
  0x17   :  { %69 = dma.hbm_to_vmem [thread:$0]  %s1227_s5, 2048, %s64_s12, [#allocation9], %s1118_s14, %s1118_s14, %s1119_s15  }
  0x18   :  { %s1120_s21 = smov [#allocation2]   ;;  %s1121_s23 = smov [#allocation7]  }
  0x19   :  { %s23_s22 = sshll.u32 %s1120_s21, 4  ;;  %s49_s24 = sshll.u32 %s1121_s23, 4  ;;  %s24_s22 = int_to_ptr.vmem [resolvable:$true] %s23_s22  ;;  %s50_s24 = int_to_ptr.vmem [resolvable:$true] %s49_s24 }
  0x1a   :  { %s1036_s1 = scalar_lea.vmem %s24_s22, 1024  ;;  %p1041_p11 = scmp.lt.s32.totalorder %s24_s22, %s24_s22 }
  0x1b   :  { %p1037_p10 = scmp.ne.s32.totalorder %s24_s22, %s1036_s1  ;;  %p1042_p12 = scmp.lt.s32.totalorder %s1036_s1, %s1036_s1 }
  0x1d   :  { %p1043_p13 = por %p1042_p12, %p1041_p11 }
  0x1f   :  { %p1044_p0 = pnand %p1043_p13, %p1037_p10 }
  0x21   :  { %1047 = shalt.err (!%p1044_p0)
}
  0x22   :  { %29 = dma.hbm_to_vmem [thread:$0]  %s1222_s0, 1024, %s24_s22, [#allocation3], %s1118_s14, %s1118_s14, %s1119_s15  }
  0x23   :  { %s1056_s5 = scalar_lea.vmem %s50_s24, 2048  ;;  %p1061_p2 = scmp.lt.s32.totalorder %s50_s24, %s50_s24 }
  0x24   :  { %p1057_p1 = scmp.ne.s32.totalorder %s50_s24, %s1056_s5  ;;  %p1062_p3 = scmp.lt.s32.totalorder %s1056_s5, %s1056_s5 }
  0x26   :  { %p1063_p4 = por %p1062_p3, %p1061_p2 }
  0x28   :  { %p1064_p5 = pnand %p1063_p4, %p1057_p1 }
  0x2a   :  { %1067 = shalt.err (!%p1064_p5)
}
  0x2b   :  { %55 = dma.hbm_to_vmem [thread:$0]  %s1225_s3, 2048, %s50_s24, [#allocation6], %s1118_s14, %s1118_s14, %s1119_s15  }
  0x2c   :  { %s1122_s29 = smov [#allocation10]  }
  0x2d   :  { %s77_s30 = sshll.u32 %s1122_s29, 4  ;;  %s78_s30 = int_to_ptr.vmem [resolvable:$true] %s77_s30 }
  0x2e   :  { %s1076_s10 = scalar_lea.vmem %s78_s30, 2048  ;;  %p1081_p7 = scmp.lt.s32.totalorder %s78_s30, %s78_s30 }
  0x2f   :  { %p1077_p6 = scmp.ne.s32.totalorder %s78_s30, %s1076_s10  ;;  %p1082_p8 = scmp.lt.s32.totalorder %s1076_s10, %s1076_s10 }
  0x31   :  { %p1083_p9 = por %p1082_p8, %p1081_p7 }
  0x33   :  { %p1084_p10 = pnand %p1083_p9, %p1077_p6 }
  0x35   :  { %1087 = shalt.err (!%p1084_p10)
}
  0x36   :  { %83 = dma.hbm_to_vmem [thread:$0]  %s1229_s7, 2048, %s78_s30, [#allocation9], %s1118_s14, %s1118_s14, %s1119_s15  }
  0x37   :  { %1108 = dma.done.wait [#allocation3], 1024  }
  0x38   :  { %1109 = vsyncadd [#allocation3], 4294966272 }
  0x39   :  { %1110 = dma.done.wait [#allocation6], 4096  }
  0x3a   :  { %1111 = vsyncadd [#allocation6], 4294963200 }
  0x3b   :  { %1112 = dma.done.wait [#allocation9], 4096  }
  0x3c   :  { %1113 = vsyncadd [#allocation9], 4294963200  ;;  %v124_v0 = vld [vmem:[#allocation5 + $0x78] sm:$0xff]  ;;  %v123_v1 = vld [vmem:[#allocation5 + $0x70] sm:$0xff] }
  0x3d   :  { %788 = vmatprep.subr.mxu0 %v124_v0  ;;  %v122_v2 = vld [vmem:[#allocation5 + $0x68] sm:$0xff]  ;;  %v121_v3 = vld [vmem:[#allocation5 + $0x60] sm:$0xff]  ;;  %v120_v5 = vld [vmem:[#allocation5 + $0x58] sm:$0xff] }
  0x3e   :  { %789 = vmatpush3.msra.mxu0 %v124_v0  ;;  %v101_v4 = vld [vmem:[#allocation2] sm:$0xff]  ;;  %v119_v6 = vld [vmem:[#allocation5 + $0x50] sm:$0xff]  ;;  %v260_v7 = vld [vmem:[#allocation7 + $0x78] sm:$0xff] }
  0x3f   :  { %790 = vmatprep.subr.mxu0 %v123_v1  ;;  %820 = vmatprep.mubr.f32.mxu0 %v101_v4  ;;  %v259_v8 = vld [vmem:[#allocation7 + $0x70] sm:$0xff]  ;;  %v118_v9 = vld [vmem:[#allocation5 + $0x48] sm:$0xff]  ;;  %v117_v11 = vld [vmem:[#allocation5 + $0x40] sm:$0xff] }
  0x40   :  { %791 = vmatpush3.msra.mxu0 %v123_v1  ;;  %832 = vmatprep.subr.mxu1 %v260_v7  ;;  %v258_v10 = vld [vmem:[#allocation7 + $0x68] sm:$0xff]  ;;  %v257_v12 = vld [vmem:[#allocation7 + $0x60] sm:$0xff]  ;;  %v116_v13 = vld [vmem:[#allocation5 + $0x38] sm:$0xff] }
  0x41   :  { %792 = vmatprep.subr.mxu0 %v122_v2  ;;  %833 = vmatpush3.msra.mxu1 %v260_v7  ;;  %v256_v14 = vld [vmem:[#allocation7 + $0x58] sm:$0xff]  ;;  %v115_v15 = vld [vmem:[#allocation5 + $0x30] sm:$0xff]  ;;  %v114_v17 = vld [vmem:[#allocation5 + $0x28] sm:$0xff] }
  0x42   :  { %793 = vmatpush3.msra.mxu0 %v122_v2  ;;  %834 = vmatprep.subr.mxu1 %v259_v8  ;;  %v255_v16 = vld [vmem:[#allocation7 + $0x50] sm:$0xff]  ;;  %v254_v18 = vld [vmem:[#allocation7 + $0x48] sm:$0xff]  ;;  %v113_v19 = vld [vmem:[#allocation5 + $0x20] sm:$0xff] }
  0x43   :  { %794 = vmatprep.subr.mxu0 %v121_v3  ;;  %835 = vmatpush3.msra.mxu1 %v259_v8  ;;  %v253_v20 = vld [vmem:[#allocation7 + $0x40] sm:$0xff]  ;;  %v112_v21 = vld [vmem:[#allocation5 + $0x18] sm:$0xff]  ;;  %v111_v23 = vld [vmem:[#allocation5 + $0x10] sm:$0xff] }
  0x44   :  { %795 = vmatpush3.msra.mxu0 %v121_v3  ;;  %836 = vmatprep.subr.mxu1 %v258_v10  ;;  %v252_v22 = vld [vmem:[#allocation7 + $0x38] sm:$0xff]  ;;  %v251_v24 = vld [vmem:[#allocation7 + $0x30] sm:$0xff]  ;;  %v110_v25 = vld [vmem:[#allocation5 + $0x8] sm:$0xff] }
  0x45   :  { %796 = vmatprep.subr.mxu0 %v120_v5  ;;  %837 = vmatpush3.msra.mxu1 %v258_v10  ;;  %v250_v26 = vld [vmem:[#allocation7 + $0x28] sm:$0xff]  ;;  %v109_v27 = vld [vmem:[#allocation5] sm:$0xff]  ;;  %v103_v30 = vld [vmem:[#allocation2 + $0x10] sm:$0xff] }
  0x46   :  { %797 = vmatpush3.msra.mxu0 %v120_v5  ;;  %838 = vmatprep.subr.mxu1 %v257_v12  ;;  %v249_v28 = vld [vmem:[#allocation7 + $0x20] sm:$0xff]  ;;  %v102_v29 = vld [vmem:[#allocation2 + $0x8] sm:$0xff]  ;;  %v104_v31 = vld [vmem:[#allocation2 + $0x18] sm:$0xff] }
  0x47   :  { %798 = vmatprep.subr.mxu0 %v119_v6  ;;  %839 = vmatpush3.msra.mxu1 %v257_v12  ;;  %v105_v32 = vld [vmem:[#allocation2 + $0x20] sm:$0xff]  ;;  %v106_v33 = vld [vmem:[#allocation2 + $0x28] sm:$0xff]  ;;  %v107_v34 = vld [vmem:[#allocation2 + $0x30] sm:$0xff] }
  0x48   :  { %799 = vmatpush3.msra.mxu0 %v119_v6  ;;  %840 = vmatprep.subr.mxu1 %v256_v14  ;;  %v108_v35 = vld [vmem:[#allocation2 + $0x38] sm:$0xff]  ;;  %v247_v37 = vld [vmem:[#allocation7 + $0x10] sm:$0xff]  ;;  %v246_v38 = vld [vmem:[#allocation7 + $0x8] sm:$0xff] }
  0x49   :  { %800 = vmatprep.subr.mxu0 %v118_v9  ;;  %841 = vmatpush3.msra.mxu1 %v256_v14  ;;  %v248_v36 = vld [vmem:[#allocation7 + $0x18] sm:$0xff]  ;;  %v245_v39 = vld [vmem:[#allocation7] sm:$0xff]  ;;  %v395_v41 = vld [vmem:[#allocation8 + $0x70] sm:$0xff] }
  0x4a   :  { %801 = vmatpush3.msra.mxu0 %v118_v9  ;;  %842 = vmatprep.subr.mxu1 %v255_v16  ;;  %v396_v40 = vld [vmem:[#allocation8 + $0x78] sm:$0xff]  ;;  %v394_v42 = vld [vmem:[#allocation8 + $0x68] sm:$0xff]  ;;  %v393_v43 = vld [vmem:[#allocation8 + $0x60] sm:$0xff] }
  0x4b   :  { %802 = vmatprep.subr.mxu0 %v117_v11  ;;  %843 = vmatpush3.msra.mxu1 %v255_v16  ;;  %v392_v44 = vld [vmem:[#allocation8 + $0x58] sm:$0xff]  ;;  %v391_v45 = vld [vmem:[#allocation8 + $0x50] sm:$0xff]  ;;  %v390_v46 = vld [vmem:[#allocation8 + $0x48] sm:$0xff] }
  0x4c   :  { %803 = vmatpush3.msra.mxu0 %v117_v11  ;;  %844 = vmatprep.subr.mxu1 %v254_v18  ;;  %v389_v47 = vld [vmem:[#allocation8 + $0x40] sm:$0xff]  ;;  %v388_v48 = vld [vmem:[#allocation8 + $0x38] sm:$0xff]  ;;  %v387_v49 = vld [vmem:[#allocation8 + $0x30] sm:$0xff] }
  0x4d   :  { %804 = vmatprep.subr.mxu0 %v116_v13  ;;  %845 = vmatpush3.msra.mxu1 %v254_v18  ;;  %v386_v50 = vld [vmem:[#allocation8 + $0x28] sm:$0xff]  ;;  %v385_v51 = vld [vmem:[#allocation8 + $0x20] sm:$0xff]  ;;  %v383_v14 = vld [vmem:[#allocation8 + $0x10] sm:$0xff] }
  0x4e   :  { %805 = vmatpush3.msra.mxu0 %v116_v13  ;;  %846 = vmatprep.subr.mxu1 %v253_v20  ;;  %v688_v52 = vld [vmem:[%s1224_s2] ss:$0 sm:$0xff]  ;;  %v384_v13 = vld [vmem:[#allocation8 + $0x18] sm:$0xff]  ;;  %v531_v18 = vld [vmem:[#allocation10 + $0x70] sm:$0xff] }
  0x4f   :  { %806 = vmatprep.subr.mxu0 %v115_v15  ;;  %847 = vmatpush3.msra.mxu1 %v253_v20  ;;  %v381_v16 = vld [vmem:[#allocation8] sm:$0xff] }
  0x50   :  { %807 = vmatpush3.msra.mxu0 %v115_v15  ;;  %848 = vmatprep.subr.mxu1 %v252_v22  ;;  %v382_v15 = vld [vmem:[#allocation8 + $0x8] sm:$0xff]  ;;  %v529_v20 = vld [vmem:[#allocation10 + $0x60] sm:$0xff] }
  0x51   :  { %808 = vmatprep.subr.mxu0 %v114_v17  ;;  %849 = vmatpush3.msra.mxu1 %v252_v22  ;;  %v527_v22 = vld [vmem:[#allocation10 + $0x50] sm:$0xff] }
  0x52   :  { %809 = vmatpush3.msra.mxu0 %v114_v17  ;;  %850 = vmatprep.subr.mxu1 %v251_v24  ;;  %v532_v17 = vld [vmem:[#allocation10 + $0x78] sm:$0xff] }
  0x53   :  { %810 = vmatprep.subr.mxu0 %v113_v19  ;;  %851 = vmatpush3.msra.mxu1 %v251_v24 }
  0x54   :  { %811 = vmatpush3.msra.mxu0 %v113_v19  ;;  %852 = vmatprep.subr.mxu1 %v250_v26  ;;  %v530_v19 = vld [vmem:[#allocation10 + $0x68] sm:$0xff] }
  0x55   :  { %812 = vmatprep.subr.mxu0 %v112_v21  ;;  %853 = vmatpush3.msra.mxu1 %v250_v26 }
  0x56   :  { %813 = vmatpush3.msra.mxu0 %v112_v21  ;;  %854 = vmatprep.subr.mxu1 %v249_v28  ;;  %v528_v21 = vld [vmem:[#allocation10 + $0x58] sm:$0xff] }
  0x57   :  { %814 = vmatprep.subr.mxu0 %v111_v23  ;;  %855 = vmatpush3.msra.mxu1 %v249_v28 }
  0x58   :  { %815 = vmatpush3.msra.mxu0 %v111_v23  ;;  %856 = vmatprep.subr.mxu1 %v248_v36  ;;  %v689_v23 = vld [vmem:[%s1226_s4] ss:$0 sm:$0xff] }
  0x59   :  { %816 = vmatprep.subr.mxu0 %v110_v25  ;;  %857 = vmatpush3.msra.mxu1 %v248_v36 }
  0x5a   :  { %817 = vmatpush3.msra.mxu0 %v110_v25  ;;  %858 = vmatprep.subr.mxu1 %v247_v37 }
  0x5b   :  { %818 = vmatprep.subr.mxu0 %v109_v27  ;;  %859 = vmatpush3.msra.mxu1 %v247_v37 }
  0x5c   :  { %819 = vmatpush3.msra.mxu0 %v109_v27  ;;  %860 = vmatprep.subr.mxu1 %v246_v38 }
  0x5d   :  { %821 = vmatmul.mubr.f32.vlgmr.msra.gmra.mxu0 %v102_v29  ;;  %861 = vmatpush3.msra.mxu1 %v246_v38 }
  0x5e   :  { %823 = vmatprep.mubr.f32.mxu0 %v103_v30  ;;  %862 = vmatprep.subr.mxu1 %v245_v39 }
  0x5f   :  { %863 = vmatpush3.msra.mxu1 %v245_v39  ;;  %876 = vmatprep.subr.mxu0 %v396_v40 }
  0x60   :  { %877 = vmatpush3.msra.mxu0 %v396_v40  ;;  %920 = vmatprep.subr.mxu1 %v532_v17 }
  0x61   :  { %824 = vmatmul.mubr.f32.gmra.mxu0 %v104_v31  ;;  %878 = vmatprep.subr.mxu0 %v395_v41 }
  0x62   :  { %826 = vmatprep.mubr.f32.mxu0 %v105_v32  ;;  %879 = vmatpush3.msra.mxu0 %v395_v41 }
  0x63   :  { %880 = vmatprep.subr.mxu0 %v394_v42 }
  0x64   :  { %881 = vmatpush3.msra.mxu0 %v394_v42 }
  0x65   :  { %827 = vmatmul.mubr.f32.gmra.mxu0 %v106_v33  ;;  %882 = vmatprep.subr.mxu0 %v393_v43 }
  0x66   :  { %829 = vmatprep.mubr.f32.mxu0 %v107_v34  ;;  %883 = vmatpush3.msra.mxu0 %v393_v43 }
  0x67   :  { %884 = vmatprep.subr.mxu0 %v392_v44 }
  0x68   :  { %885 = vmatpush3.msra.mxu0 %v392_v44 }
  0x69   :  { %830 = vmatmul.mubr.f32.gmra.mxu0 %v108_v35  ;;  %886 = vmatprep.subr.mxu0 %v391_v45 }
  0x6a   :  { %887 = vmatpush3.msra.mxu0 %v391_v45 }
  0x6b   :  { %888 = vmatprep.subr.mxu0 %v390_v46 }
  0x6c   :  { %889 = vmatpush3.msra.mxu0 %v390_v46 }
  0x6d   :  { %890 = vmatprep.subr.mxu0 %v389_v47 }
  0x6e   :  { %891 = vmatpush3.msra.mxu0 %v389_v47 }
  0x6f   :  { %892 = vmatprep.subr.mxu0 %v388_v48 }
  0x70   :  { %893 = vmatpush3.msra.mxu0 %v388_v48  ;;  %v526_v48 = vld [vmem:[#allocation10 + $0x48] sm:$0xff] }
  0x71   :  { %894 = vmatprep.subr.mxu0 %v387_v49 }
  0x72   :  { %895 = vmatpush3.msra.mxu0 %v387_v49  ;;  %v525_v49 = vld [vmem:[#allocation10 + $0x40] sm:$0xff] }
  0x73   :  { %896 = vmatprep.subr.mxu0 %v386_v50 }
  0x74   :  { %897 = vmatpush3.msra.mxu0 %v386_v50  ;;  %v524_v50 = vld [vmem:[#allocation10 + $0x38] sm:$0xff] }
  0x75   :  { %898 = vmatprep.subr.mxu0 %v385_v51 }
  0x76   :  { %899 = vmatpush3.msra.mxu0 %v385_v51  ;;  %v523_v51 = vld [vmem:[#allocation10 + $0x30] sm:$0xff] }
  0x77   :  { %900 = vmatprep.subr.mxu0 %v384_v13 }
  0x78   :  { %901 = vmatpush3.msra.mxu0 %v384_v13 }
  0x79   :  { %902 = vmatprep.subr.mxu0 %v383_v14 }
  0x7a   :  { %903 = vmatpush3.msra.mxu0 %v383_v14 }
  0x7b   :  { %904 = vmatprep.subr.mxu0 %v382_v15 }
  0x7c   :  { %905 = vmatpush3.msra.mxu0 %v382_v15 }
  0x7d   :  { %906 = vmatprep.subr.mxu0 %v381_v16 }
  0x7e   :  { %907 = vmatpush3.msra.mxu0 %v381_v16 }
 0x11d   :  { %v822_v53 = vpop.f32.mrf.mxu0 }
 0x11e   :  { %v204_v54 = vadd.f32 %v822_v53, %v688_v52  ;;  %v521_v53 = vld [vmem:[#allocation10 + $0x20] sm:$0xff] }
 0x11f   :  { %v198_v55 = vpop.f32.mrf.mxu0 }
 0x120   :  { %v199_v56 = vadd.f32 %v688_v52, %v198_v55  ;;  %v238_v59 = vmax.f32 %v204_v54, 0.0  ;;  %v520_v54 = vld [vmem:[#allocation10 + $0x18] sm:$0xff]  ;;  %v519_v55 = vld [vmem:[#allocation10 + $0x10] sm:$0xff] }
 0x121   :  { %v825_v57 = vpop.f32.mrf.mxu0 }
 0x122   :  { %v237_v58 = vmax.f32 %v199_v56, 0.0  ;;  %v214_v60 = vadd.f32 %v825_v57, %v688_v52  ;;  %v518_v56 = vld [vmem:[#allocation10 + $0x8] sm:$0xff]  ;;  %v517_v57 = vld [vmem:[#allocation10] sm:$0xff] }
 0x123   :  { %v208_v61 = vpop.f32.mrf.mxu0 }
 0x124   :  { %v209_v62 = vadd.f32 %v688_v52, %v208_v61  ;;  %864 = vmatprep.mubr.f32.mxu1 %v237_v58  ;;  %v240_v1 = vmax.f32 %v214_v60, 0.0  ;;  %v690_v58 = vld [vmem:[%s1228_s6] ss:$0 sm:$0xff] }
 0x125   :  { %v828_v63 = vpop.f32.mrf.mxu0  ;;  %865 = vmatmul.mubr.f32.vlgmr.msra.gmra.mxu1 %v238_v59 }
 0x126   :  { %v239_v0 = vmax.f32 %v209_v62, 0.0  ;;  %v224_v2 = vadd.f32 %v828_v63, %v688_v52  ;;  %921 = vmatpush3.msra.mxu1 %v532_v17 }
 0x127   :  { %v218_v3 = vpop.f32.mrf.mxu0  ;;  %922 = vmatprep.subr.mxu1 %v531_v18 }
 0x128   :  { %v219_v4 = vadd.f32 %v688_v52, %v218_v3  ;;  %867 = vmatprep.mubr.f32.mxu1 %v239_v0  ;;  %v242_v7 = vmax.f32 %v224_v2, 0.0  ;;  %923 = vmatpush3.msra.mxu1 %v531_v18 }
 0x129   :  { %v831_v5 = vpop.f32.mrf.mxu0  ;;  %868 = vmatmul.mubr.f32.gmra.mxu1 %v240_v1  ;;  %924 = vmatprep.subr.mxu1 %v530_v19 }
 0x12a   :  { %v241_v6 = vmax.f32 %v219_v4, 0.0  ;;  %v234_v8 = vadd.f32 %v831_v5, %v688_v52  ;;  %925 = vmatpush3.msra.mxu1 %v530_v19  ;;  %v691_v19 = vld [vmem:[%s1230_s8] ss:$0 sm:$0xff]  ;;  %s1123_s8 = smov [#allocation11]  }
 0x12b   :  { %v228_v9 = vpop.f32.mrf.mxu0  ;;  %926 = vmatprep.subr.mxu1 %v529_v20  ;;  %s674_s17 = sshll.u32 %s1123_s8, 4  ;;  %s675_s17 = int_to_ptr.vmem [resolvable:$true] %s674_s17 }
 0x12c   :  { %v229_v10 = vadd.f32 %v688_v52, %v228_v9  ;;  %870 = vmatprep.mubr.f32.mxu1 %v241_v6  ;;  %v244_v12 = vmax.f32 %v234_v8, 0.0  ;;  %927 = vmatpush3.msra.mxu1 %v529_v20  ;;  %v522_v52 = vld [vmem:[#allocation10 + $0x28] sm:$0xff]  ;;  %s1088_s18 = scalar_lea.vmem %s675_s17, 1024  ;;  %p1093_p12 = scmp.lt.s32.totalorder %s675_s17, %s675_s17 }
 0x12d   :  { %871 = vmatmul.mubr.f32.gmra.mxu1 %v242_v7  ;;  %928 = vmatprep.subr.mxu1 %v528_v21  ;;  %p1089_p11 = scmp.ne.s32.totalorder %s675_s17, %s1088_s18  ;;  %p1094_p13 = scmp.lt.s32.totalorder %s1088_s18, %s1088_s18 }
 0x12e   :  { %v243_v11 = vmax.f32 %v229_v10, 0.0  ;;  %929 = vmatpush3.msra.mxu1 %v528_v21 }
 0x12f   :  { %930 = vmatprep.subr.mxu1 %v527_v22  ;;  %p1095_p0 = por %p1094_p13, %p1093_p12 }
 0x130   :  { %873 = vmatprep.mubr.f32.mxu1 %v243_v11  ;;  %931 = vmatpush3.msra.mxu1 %v527_v22 }
 0x131   :  { %874 = vmatmul.mubr.f32.gmra.mxu1 %v244_v12  ;;  %932 = vmatprep.subr.mxu1 %v526_v48  ;;  %p1096_p1 = pnand %p1095_p0, %p1089_p11 }
 0x132   :  { %933 = vmatpush3.msra.mxu1 %v526_v48 }
 0x133   :  { %934 = vmatprep.subr.mxu1 %v525_v49 }
 0x134   :  { %935 = vmatpush3.msra.mxu1 %v525_v49 }
 0x135   :  { %936 = vmatprep.subr.mxu1 %v524_v50 }
 0x136   :  { %937 = vmatpush3.msra.mxu1 %v524_v50 }
 0x137   :  { %938 = vmatprep.subr.mxu1 %v523_v51 }
 0x138   :  { %939 = vmatpush3.msra.mxu1 %v523_v51 }
 0x139   :  { %940 = vmatprep.subr.mxu1 %v522_v52 }
 0x13a   :  { %941 = vmatpush3.msra.mxu1 %v522_v52 }
 0x13b   :  { %942 = vmatprep.subr.mxu1 %v521_v53 }
 0x13c   :  { %943 = vmatpush3.msra.mxu1 %v521_v53 }
 0x13d   :  { %944 = vmatprep.subr.mxu1 %v520_v54 }
 0x13e   :  { %945 = vmatpush3.msra.mxu1 %v520_v54 }
 0x13f   :  { %946 = vmatprep.subr.mxu1 %v519_v55 }
 0x140   :  { %947 = vmatpush3.msra.mxu1 %v519_v55 }
 0x141   :  { %948 = vmatprep.subr.mxu1 %v518_v56 }
 0x142   :  { %949 = vmatpush3.msra.mxu1 %v518_v56 }
 0x143   :  { %950 = vmatprep.subr.mxu1 %v517_v57 }
 0x144   :  { %951 = vmatpush3.msra.mxu1 %v517_v57 }
 0x1e5   :  { %v866_v24 = vpop.f32.mrf.mxu1 }
 0x1e6   :  { %v340_v25 = vadd.f32 %v866_v24, %v689_v23 }
 0x1e7   :  { %v334_v26 = vpop.f32.mrf.mxu1 }
 0x1e8   :  { %v335_v27 = vadd.f32 %v689_v23, %v334_v26  ;;  %v374_v30 = vmax.f32 %v340_v25, 0.0 }
 0x1e9   :  { %v869_v28 = vpop.f32.mrf.mxu1 }
 0x1ea   :  { %v373_v29 = vmax.f32 %v335_v27, 0.0  ;;  %v350_v31 = vadd.f32 %v869_v28, %v689_v23 }
 0x1eb   :  { %v344_v32 = vpop.f32.mrf.mxu1 }
 0x1ec   :  { %v345_v33 = vadd.f32 %v689_v23, %v344_v32  ;;  %908 = vmatprep.mubr.f32.mxu0 %v373_v29  ;;  %v376_v36 = vmax.f32 %v350_v31, 0.0 }
 0x1ed   :  { %v872_v34 = vpop.f32.mrf.mxu1  ;;  %909 = vmatmul.mubr.f32.vlgmr.msra.gmra.mxu0 %v374_v30 }
 0x1ee   :  { %v375_v35 = vmax.f32 %v345_v33, 0.0  ;;  %v360_v37 = vadd.f32 %v872_v34, %v689_v23 }
 0x1ef   :  { %v354_v38 = vpop.f32.mrf.mxu1 }
 0x1f0   :  { %v355_v39 = vadd.f32 %v689_v23, %v354_v38  ;;  %911 = vmatprep.mubr.f32.mxu0 %v375_v35  ;;  %v378_v42 = vmax.f32 %v360_v37, 0.0 }
 0x1f1   :  { %v875_v40 = vpop.f32.mrf.mxu1  ;;  %912 = vmatmul.mubr.f32.gmra.mxu0 %v376_v36 }
 0x1f2   :  { %v377_v41 = vmax.f32 %v355_v39, 0.0  ;;  %v370_v43 = vadd.f32 %v875_v40, %v689_v23 }
 0x1f3   :  { %v364_v44 = vpop.f32.mrf.mxu1 }
 0x1f4   :  { %v365_v45 = vadd.f32 %v689_v23, %v364_v44  ;;  %914 = vmatprep.mubr.f32.mxu0 %v377_v41  ;;  %v380_v47 = vmax.f32 %v370_v43, 0.0 }
 0x1f5   :  { %915 = vmatmul.mubr.f32.gmra.mxu0 %v378_v42 }
 0x1f6   :  { %v379_v46 = vmax.f32 %v365_v45, 0.0 }
 0x1f8   :  { %917 = vmatprep.mubr.f32.mxu0 %v379_v46 }
 0x1f9   :  { %918 = vmatmul.mubr.f32.gmra.mxu0 %v380_v47 }
 0x2ad   :  { %v910_v59 = vpop.f32.mrf.mxu0 }
 0x2ae   :  { %v476_v60 = vadd.f32 %v910_v59, %v690_v58 }
 0x2af   :  { %v470_v61 = vpop.f32.mrf.mxu0 }
 0x2b0   :  { %v471_v62 = vadd.f32 %v690_v58, %v470_v61 }
 0x2b1   :  { %v913_v63 = vpop.f32.mrf.mxu0 }
 0x2b2   :  { %972 = vtanh.f32 %v471_v62  ;;  %v486_v0 = vadd.f32 %v913_v63, %v690_v58 }
 0x2b3   :  { %974 = vtanh.f32 %v476_v60  ;;  %v480_v1 = vpop.f32.mrf.mxu0 }
 0x2b4   :  { %v481_v2 = vadd.f32 %v690_v58, %v480_v1 }
 0x2b5   :  { %v916_v3 = vpop.f32.mrf.mxu0 }
 0x2b6   :  { %976 = vtanh.f32 %v481_v2  ;;  %v496_v4 = vadd.f32 %v916_v3, %v690_v58 }
 0x2b7   :  { %978 = vtanh.f32 %v486_v0  ;;  %v490_v5 = vpop.f32.mrf.mxu0 }
 0x2b8   :  { %v491_v6 = vadd.f32 %v690_v58, %v490_v5 }
 0x2b9   :  { %v919_v7 = vpop.f32.mrf.mxu0 }
 0x2ba   :  { %980 = vtanh.f32 %v491_v6  ;;  %v506_v8 = vadd.f32 %v919_v7, %v690_v58 }
 0x2bb   :  { %982 = vtanh.f32 %v496_v4  ;;  %v500_v9 = vpop.f32.mrf.mxu0 }
 0x2bc   :  { %v501_v10 = vadd.f32 %v690_v58, %v500_v9 }
 0x2be   :  { %984 = vtanh.f32 %v501_v10 }
 0x2bf   :  { %v973_v11 = vpop.eup %972  ;;  %986 = vtanh.f32 %v506_v8 }
 0x2c0   :  { %v975_v12 = vpop.eup %974  ;;  %952 = vmatprep.mubr.f32.mxu1 %v973_v11 }
 0x2c1   :  { %953 = vmatmul.mubr.f32.vlgmr.msra.gmra.mxu1 %v975_v12 }
 0x2c3   :  { %v977_v13 = vpop.eup %976 }
 0x2c4   :  { %v979_v14 = vpop.eup %978  ;;  %955 = vmatprep.mubr.f32.mxu1 %v977_v13 }
 0x2c5   :  { %956 = vmatmul.mubr.f32.gmra.mxu1 %v979_v14 }
 0x2c7   :  { %v981_v15 = vpop.eup %980 }
 0x2c8   :  { %v983_v16 = vpop.eup %982  ;;  %958 = vmatprep.mubr.f32.mxu1 %v981_v15 }
 0x2c9   :  { %959 = vmatmul.mubr.f32.gmra.mxu1 %v983_v16 }
 0x2cb   :  { %v985_v17 = vpop.eup %984 }
 0x2cc   :  { %v987_v18 = vpop.eup %986  ;;  %961 = vmatprep.mubr.f32.mxu1 %v985_v17 }
 0x2cd   :  { %962 = vmatmul.mubr.f32.gmra.mxu1 %v987_v18 }
 0x381   :  { %v954_v20 = vpop.f32.mrf.mxu1 }
 0x382   :  { %v612_v21 = vadd.f32 %v954_v20, %v691_v19 }
 0x383   :  { %v606_v22 = vpop.f32.mrf.mxu1 }
 0x384   :  { %v646_v23 = vmin.f32 %v612_v21, 0.5  ;;  %v607_v24 = vadd.f32 %v691_v19, %v606_v22 }
 0x385   :  { %v957_v25 = vpop.f32.mrf.mxu1 }
 0x386   :  { %v654_v26 = vmax.f32 %v646_v23, 0.0  ;;  %v645_v27 = vmin.f32 %v607_v24, 0.5  ;;  %v622_v28 = vadd.f32 %v957_v25, %v691_v19 }
 0x387   :  { %v616_v29 = vpop.f32.mrf.mxu1 }
 0x388   :  { %662 = vst [vmem:[#allocation11 + $0x8] sm:$0xff] %v654_v26  ;;  %v653_v30 = vmax.f32 %v645_v27, 0.0  ;;  %v648_v31 = vmin.f32 %v622_v28, 0.5  ;;  %v617_v32 = vadd.f32 %v691_v19, %v616_v29 }
 0x389   :  { %v960_v33 = vpop.f32.mrf.mxu1 }
 0x38a   :  { %661 = vst [vmem:[#allocation11] sm:$0xff] %v653_v30  ;;  %v656_v34 = vmax.f32 %v648_v31, 0.0  ;;  %v647_v35 = vmin.f32 %v617_v32, 0.5  ;;  %v632_v36 = vadd.f32 %v960_v33, %v691_v19 }
 0x38b   :  { %v626_v37 = vpop.f32.mrf.mxu1 }
 0x38c   :  { %664 = vst [vmem:[#allocation11 + $0x18] sm:$0xff] %v656_v34  ;;  %v655_v38 = vmax.f32 %v647_v35, 0.0  ;;  %v650_v39 = vmin.f32 %v632_v36, 0.5  ;;  %v627_v40 = vadd.f32 %v691_v19, %v626_v37 }
 0x38d   :  { %v963_v41 = vpop.f32.mrf.mxu1 }
 0x38e   :  { %663 = vst [vmem:[#allocation11 + $0x10] sm:$0xff] %v655_v38  ;;  %v658_v42 = vmax.f32 %v650_v39, 0.0  ;;  %v649_v43 = vmin.f32 %v627_v40, 0.5  ;;  %v642_v44 = vadd.f32 %v963_v41, %v691_v19 }
 0x38f   :  { %v636_v45 = vpop.f32.mrf.mxu1 }
 0x390   :  { %666 = vst [vmem:[#allocation11 + $0x28] sm:$0xff] %v658_v42  ;;  %v657_v46 = vmax.f32 %v649_v43, 0.0  ;;  %v652_v47 = vmin.f32 %v642_v44, 0.5  ;;  %v637_v48 = vadd.f32 %v691_v19, %v636_v45 }
 0x392   :  { %665 = vst [vmem:[#allocation11 + $0x20] sm:$0xff] %v657_v46  ;;  %v660_v49 = vmax.f32 %v652_v47, 0.0  ;;  %v651_v50 = vmin.f32 %v637_v48, 0.5 }
 0x394   :  { %668 = vst [vmem:[#allocation11 + $0x38] sm:$0xff] %v660_v49  ;;  %v659_v51 = vmax.f32 %v651_v50, 0.0 }
 0x396   :  { %667 = vst [vmem:[#allocation11 + $0x30] sm:$0xff] %v659_v51 }
 0x397   :  { %1099 = shalt.err (!%p1096_p1)
}
 0x398   :  { %680 = dma.vmem_to_hbm [thread:$0]  %s675_s17, 1024, %s1231_s9, [#allocation4], %s1118_s14, %s1118_s14, %s1119_s15  }
 0x399   :  { %1114 = dma.done.wait [#allocation4], 1024  }
 0x39a   :  { %1115 = vsyncadd [#allocation4], 4294966272 }
 0x39b   :  { %684 = vsyncpa [#allocation3], 1 }
 0x39c   :  { %685 = vsyncpa [#allocation6], 1 }
 0x39d   :  { %686 = vsyncpa [#allocation9], 1 }
 0x39e   :  { %687 = vsyncpa [#allocation4], 1 }

</bundles_post_ra>
